<compile_context>
chip_gen: v7x
topology: tpu7x:2x2x1
jax: 0.10.0
libtpu: 0.0.40
codegen_flags: <defaults>
</compile_context>

<pallas_src>
import functools
import math

import jax
import jax.numpy as jnp
from jax import lax
from jax.experimental import pallas as pl
from jax.experimental.pallas import tpu as pltpu

DEFAULT_EPS = 1e-6
_LN2 = math.log(2.0)
_NUM_CORE_SPLITS = 2          # v7x has 2 TensorCores; harmless on 1-TC chips


# --------------------------- sizing helpers ---------------------------------
def _vmem_capacity_bytes() -> int:
    """Physical VMEM of the current TPU generation, with a conservative
    (v7x-sized) fallback if the query is unavailable."""
    try:
        info = pltpu.get_tpu_info()
        cap = getattr(info, "vmem_capacity_bytes", None)
        if cap:
            return int(cap)
    except Exception:
        pass
    return 64 * 1024 * 1024


def _pick_tile_rows(n_rows: int, bytes_per_row: int, vmem_cap: int,
                    min_tiles: int = 4, max_rows: int = 131072) -> int:
    """Row tile sized from a VMEM-capacity-derived per-stage budget (~cap/10 of
    input+output bytes per pipeline stage, double-buffered by Pallas), while
    keeping at least `min_tiles` grid steps when there is enough work."""
    stage_budget = max(2 * 1024 * 1024, vmem_cap // 10)
    t = stage_budget // max(bytes_per_row, 1)
    t = min(t, max_rows)
    if n_rows >= min_tiles * 8:
        t = min(t, pl.cdiv(n_rows, min_tiles))
    t = max(8, (t // 8) * 8)              # sublane-aligned row tiles
    if n_rows <= t:
        return n_rows                     # single full-extent block (always legal)
    return t


# --------------------------- shared math ------------------------------------
def _nll_tile(loc, scale_raw, target, eps):
    scale = jnp.maximum(scale_raw, eps)                 # clamp_(min=eps)
    inv = pl.reciprocal(scale, approx=True)             # EUP slot (nearly free)
    inv = inv * (2.0 - scale * inv)                     # one Newton step -> ~f32 exact
    # log(2*scale) == log(scale) + ln(2): saves one vmul per element
    return (jnp.log(scale) + _LN2) + jnp.abs(target - loc) * inv


# --------------------------- reducing kernel (mean / sum) -------------------
def _laplace_nll_reduce_kernel(*refs, d, eps, n_rows, tile_rows, num_tiles,
                               tiles_per_split, needs_mask, split_pred):
    if split_pred:
        loc_ref, scale_ref, tgt_ref, out_ref, acc_ref = refs
    else:
        pred_ref, tgt_ref, out_ref, acc_ref = refs

    c = pl.program_id(0)                 # core-split ("parallel") axis
    i = pl.program_id(1)                 # within-split reduction axis
    g = c * tiles_per_split + i          # global tile id (may overshoot)

    @pl.when(i == 0)
    def _init():
        acc_ref[...] = jnp.zeros_like(acc_ref)

    def _tile_nll():
        if split_pred:
            loc = loc_ref[...].astype(jnp.float32)
            scale_raw = scale_ref[...].astype(jnp.float32)
        else:
            p = pred_ref[...].astype(jnp.float32)       # (tile_rows, 2d)
            loc = p[:, :d]                              # chunk(2, dim=-1)
            scale_raw = p[:, d:]
        t = tgt_ref[...].astype(jnp.float32)
        return _nll_tile(loc, scale_raw, t, eps)

    n_full = num_tiles - 1 if needs_mask else num_tiles

    # Steady state: full tiles accumulate per-lane partials, no masking work.
    @pl.when(g < n_full)
    def _full():
        acc_ref[...] += jnp.sum(_tile_nll(), axis=0, keepdims=True)

    if needs_mask:
        # Only the very last tile pays for iota + compare + select.
        @pl.when(g == num_tiles - 1)
        def _tail():
            nll = _tile_nll()
            row = (num_tiles - 1) * tile_rows + lax.broadcasted_iota(
                jnp.int32, nll.shape, 0)
            nll = jnp.where(row < n_rows, nll, 0.0)
            acc_ref[...] += jnp.sum(nll, axis=0, keepdims=True)

    # Write this core-split's per-lane partials exactly once.
    @pl.when(i == tiles_per_split - 1)
    def _finalize():
        out_ref[...] = jnp.broadcast_to(acc_ref[...], out_ref.shape)


# --------------------------- elementwise kernel ('none') --------------------
def _laplace_nll_elementwise_kernel(*refs, d, eps, split_pred):
    if split_pred:
        loc_ref, scale_ref, tgt_ref, out_ref = refs
        loc = loc_ref[...].astype(jnp.float32)
        scale_raw = scale_ref[...].astype(jnp.float32)
    else:
        pred_ref, tgt_ref, out_ref = refs
        p = pred_ref[...].astype(jnp.float32)
        loc = p[:, :d]
        scale_raw = p[:, d:]
    t = tgt_ref[...].astype(jnp.float32)
    out_ref[...] = _nll_tile(loc, scale_raw, t, eps).astype(out_ref.dtype)


# --------------------------- public wrapper ---------------------------------
def laplace_nll_loss(pred, target, eps: float = DEFAULT_EPS, reduction: str = "mean"):
    """pred: (..., 2*D), target: (..., D).  Matches LaplaceNLLLoss.forward."""
    if pred.shape[-1] % 2 != 0:
        raise ValueError("pred last dim must be even (loc/scale chunks)")
    d = pred.shape[-1] // 2
    if target.shape[-1] != d or pred.shape[:-1] != target.shape[:-1]:
        raise ValueError("target shape must be pred shape with half the last dim")
    if reduction not in ("mean", "sum", "none"):
        raise ValueError("{} is not a valid value for reduction".format(reduction))

    lead = pred.shape[:-1]
    n_rows = math.prod(lead) if lead else 1
    pred2 = pred.reshape(n_rows, 2 * d)          # leading-dim collapse only (free)
    tgt2 = target.reshape(n_rows, d)

    vmem_cap = _vmem_capacity_bytes()
    vmem_limit = int(min(vmem_cap * 3 // 4, 128 * 1024 * 1024))

    per_row_bytes = 2 * d * pred2.dtype.itemsize + d * tgt2.dtype.itemsize
    if reduction == "none":
        per_row_bytes += d * 4                   # pipelined f32 output tile
    tile_rows = _pick_tile_rows(n_rows, per_row_bytes, vmem_cap)
    num_tiles = pl.cdiv(n_rows, tile_rows)
    needs_mask = (n_rows % tile_rows) != 0
    split_pred = (d % 128 == 0)                  # lane-aligned loc/scale DMA tiles

    flops = 7 * n_rows * d
    transc = 2 * n_rows * d
    in_bytes = pred2.size * pred2.dtype.itemsize + tgt2.size * tgt2.dtype.itemsize

    # TODO(synk): for D < 128 (e.g. LAformer D=2) the loc/scale/target tiles are
    # lane-sparse; a fully lane-dense repack would need an in-kernel relayout
    # (XLU) or a wrapper-side copy, both of which cost more than they save for
    # this HBM-streaming loss, so it is intentionally not done.

    # ---------------- 'none': lane-parallel elementwise pass ----------------
    if reduction == "none":
        if split_pred:
            in_specs = [
                pl.BlockSpec((tile_rows, d), lambda i: (i, 0)),   # loc half
                pl.BlockSpec((tile_rows, d), lambda i: (i, 1)),   # scale half
                pl.BlockSpec((tile_rows, d), lambda i: (i, 0)),   # target
            ]
            operands = (pred2, pred2, tgt2)
        else:
            in_specs = [
                pl.BlockSpec((tile_rows, 2 * d), lambda i: (i, 0)),
                pl.BlockSpec((tile_rows, d), lambda i: (i, 0)),
            ]
            operands = (pred2, tgt2)
        kernel = functools.partial(_laplace_nll_elementwise_kernel,
                                   d=d, eps=eps, split_pred=split_pred)
        out = pl.pallas_call(
            kernel,
            out_shape=jax.ShapeDtypeStruct((n_rows, d), pred.dtype),
            grid=(num_tiles,),
            in_specs=in_specs,
            out_specs=pl.BlockSpec((tile_rows, d), lambda i: (i, 0)),
            compiler_params=pltpu.CompilerParams(
                dimension_semantics=("parallel",),        # megacore sharding
                vmem_limit_bytes=vmem_limit),
            cost_estimate=pl.CostEstimate(
                flops=flops, transcendentals=transc,
                bytes_accessed=in_bytes + n_rows * d * pred.dtype.itemsize),
        )(*operands)
        return out.reshape(*lead, d)

    # ---------------- 'mean' / 'sum': in-kernel split reduction -------------
    scale_out = (1.0 / float(n_rows * d)) if reduction == "mean" else 1.0

    tiles_per_split = pl.cdiv(num_tiles, _NUM_CORE_SPLITS)
    last_tile = num_tiles - 1

    def _gmap(c, i):
        # Clamp overshooting grid steps onto a valid tile (their contribution
        # is skipped inside the kernel), keeping every DMA in bounds.
        return jnp.minimum(c * tiles_per_split + i, last_tile)

    if split_pred:
        in_specs = [
            pl.BlockSpec((tile_rows, d), lambda c, i: (_gmap(c, i), 0)),   # loc
            pl.BlockSpec((tile_rows, d), lambda c, i: (_gmap(c, i), 1)),   # scale
            pl.BlockSpec((tile_rows, d), lambda c, i: (_gmap(c, i), 0)),   # target
        ]
        operands = (pred2, pred2, tgt2)
    else:
        in_specs = [
            pl.BlockSpec((tile_rows, 2 * d), lambda c, i: (_gmap(c, i), 0)),
            pl.BlockSpec((tile_rows, d), lambda c, i: (_gmap(c, i), 0)),
        ]
        operands = (pred2, tgt2)

    kernel = functools.partial(
        _laplace_nll_reduce_kernel, d=d, eps=eps, n_rows=n_rows,
        tile_rows=tile_rows, num_tiles=num_tiles,
        tiles_per_split=tiles_per_split, needs_mask=needs_mask,
        split_pred=split_pred)

    partials = pl.pallas_call(
        kernel,
        # One 8-row band of per-lane partials per core split (8 div. sublanes).
        out_shape=jax.ShapeDtypeStruct((_NUM_CORE_SPLITS * 8, d), jnp.float32),
        grid=(_NUM_CORE_SPLITS, tiles_per_split),
        in_specs=in_specs,
        out_specs=pl.BlockSpec((8, d), lambda c, i: (c, 0)),
        scratch_shapes=[pltpu.VMEM((1, d), jnp.float32)],
        compiler_params=pltpu.CompilerParams(
            dimension_semantics=("parallel", "arbitrary"),
            vmem_limit_bytes=vmem_limit),
        cost_estimate=pl.CostEstimate(
            flops=flops, transcendentals=transc, bytes_accessed=in_bytes),
    )(*operands)

    # Rows of each 8-row band are identical broadcasts of that split's partial.
    total = jnp.sum(partials[0::8, :]) * scale_out
    return total.astype(pred.dtype)


# --------------------------- self-test ---------------------------------------
if __name__ == "__main__":
    def ref_nll(pred, target, eps=DEFAULT_EPS):
        loc, scale = jnp.split(pred, 2, axis=-1)
        scale = jnp.maximum(scale, eps)
        return jnp.log(2.0 * scale) + jnp.abs(target - loc) / scale

    key = jax.random.PRNGKey(0)
    cases = [
        ((2, 8), 32),      # small LAformer-style case (single tile)
        ((3, 37), 32),     # multi-tile + ragged tail + uneven core split
        ((2, 8), 128),     # lane-aligned loc/scale split path (d % 128 == 0)
    ]
    for lead, d in cases:
        key, kp, kt = jax.random.split(key, 3)
        pred = jax.random.normal(kp, lead + (2 * d,), jnp.float32)
        target = jax.random.normal(kt, lead + (d,), jnp.float32)
        r = ref_nll(pred, target)

        m = jax.block_until_ready(laplace_nll_loss(pred, target))
        s = jax.block_until_ready(laplace_nll_loss(pred, target, reduction="sum"))
        n = jax.block_until_ready(laplace_nll_loss(pred, target, reduction="none"))

        assert m.shape == () and m.dtype == jnp.float32
        assert jnp.allclose(m, jnp.mean(r), rtol=1e-4, atol=1e-4), (lead, d, "mean")
        assert jnp.allclose(s, jnp.sum(r), rtol=1e-4, atol=1e-2), (lead, d, "sum")
        assert n.shape == lead + (d,)
        assert jnp.allclose(n, r, rtol=1e-4, atol=1e-4), (lead, d, "none")

    print("KERNEL_OK")
</pallas_src>

<mosaic_0001>
module attributes {stable_mosaic.version = 11 : i64} {
  func.func @_laplace_nll_reduce_kernel(%arg0: i32, %arg1: i32, %arg2: memref<16x64xf32, #tpu.memory_space<vmem>>, %arg3: memref<16x32xf32, #tpu.memory_space<vmem>>, %arg4: memref<8x32xf32, #tpu.memory_space<vmem>>, %arg5: memref<1x32xf32, #tpu.memory_space<vmem>>) attributes {dimension_semantics = [#tpu.dimension_semantics<parallel>, #tpu.dimension_semantics<arbitrary>], iteration_bounds = array<i64: 2, 1>, scalar_prefetch = 0 : i64, scratch_operands = 1 : i64, tpu.core_type = #tpu.core_type<tc>, window_params = [{transform_indices = @transform_0, window_bounds = array<i64: 16, 64>}, {transform_indices = @transform_1, window_bounds = array<i64: 16, 32>}, {transform_indices = @transform_2, window_bounds = array<i64: 8, 32>}]} {
    %c1_i32 = arith.constant 1 : i32
    %0 = arith.muli %arg0, %c1_i32 : i32
    %1 = arith.addi %0, %arg1 : i32
    %c0_i32 = arith.constant 0 : i32
    %2 = arith.cmpi eq, %arg1, %c0_i32 : i32
    %3 = arith.extui %2 : i1 to i32
    %c0_i32_0 = arith.constant 0 : i32
    %4 = arith.cmpi ne, %3, %c0_i32_0 : i32
    scf.if %4 {
      %cst = arith.constant 0.000000e+00 : f32
      %11 = vector.broadcast %cst : f32 to vector<1x32xf32>
      %c0 = arith.constant 0 : index
      %c0_5 = arith.constant 0 : index
      %12 = vector.load %arg5[%c0, %c0_5] : memref<1x32xf32, #tpu.memory_space<vmem>>, vector<1x32xf32>
      tpu.vector_store %arg5[%c0, %c0_5], %11 {strides = array<i32>} : memref<1x32xf32, #tpu.memory_space<vmem>>, vector<1x32xf32>,
    } else {
    }
    %c1_i32_1 = arith.constant 1 : i32
    %5 = arith.cmpi slt, %1, %c1_i32_1 : i32
    %6 = arith.extui %5 : i1 to i32
    %c0_i32_2 = arith.constant 0 : i32
    %7 = arith.cmpi ne, %6, %c0_i32_2 : i32
    scf.if %7 {
      %c0 = arith.constant 0 : index
      %c0_5 = arith.constant 0 : index
      %11 = vector.load %arg5[%c0, %c0_5] : memref<1x32xf32, #tpu.memory_space<vmem>>, vector<1x32xf32>
      %c0_6 = arith.constant 0 : index
      %c0_7 = arith.constant 0 : index
      %12 = vector.load %arg2[%c0_6, %c0_7] : memref<16x64xf32, #tpu.memory_space<vmem>>, vector<16x64xf32>
      %13 = vector.extract_strided_slice %12 {offsets = [0, 0], sizes = [16, 32], strides = [1, 1]} : vector<16x64xf32> to vector<16x32xf32>
      %14 = vector.extract_strided_slice %12 {offsets = [0, 32], sizes = [16, 32], strides = [1, 1]} : vector<16x64xf32> to vector<16x32xf32>
      %c0_8 = arith.constant 0 : index
      %c0_9 = arith.constant 0 : index
      %15 = vector.load %arg3[%c0_8, %c0_9] : memref<16x32xf32, #tpu.memory_space<vmem>>, vector<16x32xf32>
      %cst = arith.constant 9.99999997E-7 : f32
      %16 = vector.broadcast %cst : f32 to vector<16x32xf32>
      %17 = arith.maximumf %14, %16 : vector<16x32xf32>
      %18 = tpu.reciprocal %17 {approx = true} : vector<16x32xf32> -> vector<16x32xf32>
      %19 = arith.mulf %17, %18 : vector<16x32xf32>
      %cst_10 = arith.constant 2.000000e+00 : f32
      %20 = vector.broadcast %cst_10 : f32 to vector<16x32xf32>
      %21 = arith.subf %20, %19 : vector<16x32xf32>
      %22 = arith.mulf %18, %21 : vector<16x32xf32>
      %23 = math.log %17 : vector<16x32xf32>
      %cst_11 = arith.constant 0.693147182 : f32
      %24 = vector.broadcast %cst_11 : f32 to vector<16x32xf32>
      %25 = arith.addf %23, %24 : vector<16x32xf32>
      %26 = arith.subf %15, %13 : vector<16x32xf32>
      %27 = math.absf %26 : vector<16x32xf32>
      %28 = arith.mulf %27, %22 : vector<16x32xf32>
      %29 = arith.addf %25, %28 : vector<16x32xf32>
      %cst_12 = arith.constant dense<0.000000e+00> : vector<32xf32>
      %30 = vector.multi_reduction <add>, %29, %cst_12 [0] : vector<16x32xf32> to vector<32xf32>
      %31 = vector.shape_cast %30 : vector<32xf32> to vector<1x32xf32>
      %32 = arith.addf %11, %31 : vector<1x32xf32>
      %c0_13 = arith.constant 0 : index
      %c0_14 = arith.constant 0 : index
      %33 = vector.load %arg5[%c0_13, %c0_14] : memref<1x32xf32, #tpu.memory_space<vmem>>, vector<1x32xf32>
      tpu.vector_store %arg5[%c0_13, %c0_14], %32 {strides = array<i32>} : memref<1x32xf32, #tpu.memory_space<vmem>>, vector<1x32xf32>,
    } else {
    }
    %c0_i32_3 = arith.constant 0 : i32
    %8 = arith.cmpi eq, %arg1, %c0_i32_3 : i32
    %9 = arith.extui %8 : i1 to i32
    %c0_i32_4 = arith.constant 0 : i32
    %10 = arith.cmpi ne, %9, %c0_i32_4 : i32
    scf.if %10 {
      %c0 = arith.constant 0 : index
      %c0_5 = arith.constant 0 : index
      %11 = vector.load %arg5[%c0, %c0_5] : memref<1x32xf32, #tpu.memory_space<vmem>>, vector<1x32xf32>
      %12 = vector.shape_cast %11 : vector<1x32xf32> to vector<1x32xf32>
      %13 = vector.broadcast %12 : vector<1x32xf32> to vector<8x32xf32>
      %c0_6 = arith.constant 0 : index
      %c0_7 = arith.constant 0 : index
      %14 = vector.load %arg4[%c0_6, %c0_7] : memref<8x32xf32, #tpu.memory_space<vmem>>, vector<8x32xf32>
      tpu.vector_store %arg4[%c0_6, %c0_7], %13 {strides = array<i32>} : memref<8x32xf32, #tpu.memory_space<vmem>>, vector<8x32xf32>,
    } else {
    }
    return
  }
  func.func @transform_0(%arg0: i32, %arg1: i32) -> (i32, i32) {
    %c1_i32 = arith.constant 1 : i32
    %0 = arith.muli %arg0, %c1_i32 : i32
    %1 = arith.addi %0, %arg1 : i32
    %c0_i32 = arith.constant 0 : i32
    %2 = arith.minsi %1, %c0_i32 : i32
    %c0_i32_0 = arith.constant 0 : i32
    %c0_i32_1 = arith.constant 0 : i32
    return %2, %c0_i32_0 : i32, i32
  }
  func.func @transform_1(%arg0: i32, %arg1: i32) -> (i32, i32) {
    %c1_i32 = arith.constant 1 : i32
    %0 = arith.muli %arg0, %c1_i32 : i32
    %1 = arith.addi %0, %arg1 : i32
    %c0_i32 = arith.constant 0 : i32
    %2 = arith.minsi %1, %c0_i32 : i32
    %c0_i32_0 = arith.constant 0 : i32
    %c0_i32_1 = arith.constant 0 : i32
    return %2, %c0_i32_0 : i32, i32
  }
  func.func @transform_2(%arg0: i32, %arg1: i32) -> (i32, i32) {
    %c0_i32 = arith.constant 0 : i32
    %c0_i32_0 = arith.constant 0 : i32
    return %arg0, %c0_i32 : i32, i32
  }
}

</mosaic_0001>

<bundles_post_ra>
// kernel: tpu_custom_call.1
= control target key start
LH: loop header
LB: loop body
LE: loop exit
PB: predicated region body
PF: predicated region fallthrough
CT: control target
= control target key end

     0   :  { %7 = vsyncpa [#allocation4], 0  ;;  %s988_s0 = inlined_call_operand.hbm [shape: f32[16,64], index: 0, kind: input, shape index: {}]   ;;  %s989_s1 = inlined_call_operand.hbm [shape: f32[16,32], index: 1, kind: input, shape index: {}]   ;;  %s990_s2 = inlined_call_operand.hbm [shape: f32[16,32], index: 2, kind: output, shape index: {}]  }
   0x1   :  { %9 = vsyncpa [#allocation4 + $0x1], 0 }
   0x2   :  { %10 = vsyncpa [#allocation7], 0 }
   0x3   :  { %12 = vsyncpa [#allocation7 + $0x1], 0 }
   0x4   :  { %13 = vsyncpa [#allocation5], 0 }
   0x5   :  { %15 = vsyncpa [#allocation5 + $0x1], 0  ;;  %s774_s9 = smov 0   ;;  %s776_s10 = smov 0  }
   0x6   :  { %s778_s11 = smov 0   ;;  %s780_s12 = smov 0  }
   0x7   :  { %s782_s13 = smov 0   ;;  %s784_s14 = smov 0  }
   0x8   :  { %s786_s15 = smov 0   ;;  %s788_s16 = smov 0  }
   0x9 LB: > { %s454_s17 = sadd.s32 4294967295, %s748_s16   ;;  %s455_s18 = sadd.s32 4294967294, %s748_s16   ;;  %s748_s16 = sphi %s788_s16, %s21_s16   ;;  %s744_s15 = sphi %s786_s15, %s1009_s15   ;;  %s740_s14 = sphi %s784_s14, %s1008_s14   ;;  %s736_s13 = sphi %s782_s13, %s978_s13   ;;  %s732_s12 = sphi %s780_s12, %s1007_s12   ;;  %s728_s11 = sphi %s778_s11, %s1006_s11   ;;  %s724_s10 = sphi %s776_s10, %s1005_s10   ;;  %s720_s9 = sphi %s774_s9, %s1004_s9  }
   0xa   : > { %s33_s19 = sadd.s32 1, %s744_s15  ;;  %p717_p1 = scmp.ne.s32.totalorder %s736_s13, 0 }
   0xb   : > { %p35_p0 = scmp.ge.s32.totalorder %s33_s19, 2  ;;  %p54_p2 = scmp.eq.s32.totalorder %s748_s16, 0 }
   0xc   : > { %p59_p3 = scmp.ne.s32.totalorder %s736_s13, %s732_s12  ;;  %p60_p5 = scmp.eq.s32.totalorder %s454_s17, 0 }
   0xd   : > { %s1011_s19 = smov (%p35_p0, %s33_s19), 0  ;;  %p820_p4 = por %p717_p1, %p54_p2 }
   0xe   : > { %p824_p6 = por %p60_p5, %p59_p3  ;;  %s101_s22 = ssub.s32 %s744_s15, %s1011_s19 }
   0xf   : > { %p102_p7 = scmp.eq.s32.totalorder %s101_s22, 0  ;;  %s104_s23 = sadd.s32 1, %s728_s11 }
  0x10   : > { %s994_s21 = scalar_select %p824_p6, 1, 0 }
  0x11   : > { %s832_s24 = scalar_select %p102_p7, %s728_s11, %s104_s23  }
  0x12   : > { %p114_p8 = scmp.ne.s32.totalorder %s728_s11, %s724_s10  ;;  %p115_p9 = scmp.eq.s32.totalorder %s454_s17, 1 }
  0x13   : > { %p120_p10 = scmp.ne.s32.totalorder %s724_s10, %s720_s9  ;;  %p121_p11 = scmp.eq.s32.totalorder %s455_s18, 1 }
  0x14   : > { %p838_p12 = por %p115_p9, %p114_p8  ;;  %p493_p1 = scmp.lt.s32.totalorder %s748_s16, 2 }
  0x15   : > { %p843_p0 = por %p121_p11, %p120_p10  ;;  %s750_s27 = smov [#allocation3]  }
  0x16   : > { %s995_s25 = scalar_select %p838_p12, 1, 0 }
  0x17   : > { %s996_s26 = scalar_select %p843_p0, 1, 0 }
  0x18   : > { %s155_s28 = sshll.u32 %s750_s27, 4  ;;  %p850_p2 = pnand %p493_p1, %p820_p4  ;;  %s156_s28 = int_to_ptr.vmem [resolvable:$true] %s155_s28 }
  0x19   : > { %s581_s4 = scalar_lea.hbm %s988_s0, 256 }
  0x1a   : > { %p582_p3 = scmp.ne.s32.totalorder %s988_s0, %s581_s4  ;;  %p583_p5 = pneg %p850_p2 }
  0x1b   : > { %p588_p8 = scmp.lt.u32.totalorder %s581_s4, %s581_s4  ;;  %p590_p9 = scmp.lt.u32.totalorder %s581_s4, %s988_s0 }
  0x1c   : > { %p584_p7 = pnand %p583_p5, %p582_p3 }
  0x1d   : > { %p591_p10 = por %p590_p9, %p588_p8 }
  0x1e   : > { %p585_p4 = pneg %p584_p7 }
  0x20   : > { %p592_p11 = pnand %p591_p10, %p585_p4 }
  0x22   : > { %595 = shalt.err (!%p592_p11)
}
  0x23   : > { %s596_s12 = scalar_lea.vmem %s156_s28, 256  ;;  %s603_s17 = scalar_lea.vmem %s156_s28, 512 }
  0x24   : > { %p597_p1 = scmp.ne.s32.totalorder %s156_s28, %s596_s12  ;;  %p604_p12 = scmp.lt.s32.totalorder %s156_s28, %s156_s28 }
  0x25   : > { %p605_p6 = scmp.lt.s32.totalorder %s603_s17, %s596_s12 }
  0x26   : > { %p599_p13 = pnand %p597_p1, %p583_p5 }
  0x27   : > { %p606_p3 = por %p605_p6, %p604_p12 }
  0x28   : > { %p600_p0 = pneg %p599_p13 }
  0x2a   : > { %p607_p7 = pnand %p606_p3, %p600_p0 }
  0x2c   : > { %610 = shalt.err (!%p607_p7)
}
  0x2d   : > { %s751_s18 = smov 128   ;;  %s752_s20 = smov 8  }
  0x2e   : > { %485 = dma.hbm_to_vmem [thread:$0]  (!%p850_p2), %s988_s0, 256, %s156_s28, [#allocation4], %s751_s18, %s751_s18, %s752_s20  }
  0x2f   : > { %p464_p13 = scmp.ge.s32.totalorder %s748_s16, 1  ;;  %p187_p4 = scmp.lt.s32.totalorder %s748_s16, 3 }
  0x30   : > { %s753_s30 = smov [#allocation6]   ;;  %s611_s6 = scalar_lea.hbm %s989_s1, 256 }
  0x31   : > { %p881_p8 = pnand %p464_p13, %p187_p4  ;;  %s179_s3 = sshll.u32 %s753_s30, 4  ;;  %s180_s3 = int_to_ptr.vmem [resolvable:$true] %s179_s3 }
  0x32   : > { %p612_p6 = scmp.ne.s32.totalorder %s989_s1, %s611_s6  ;;  %p618_p9 = scmp.lt.u32.totalorder %s611_s6, %s611_s6 }
  0x33   : > { %s998_s27 = scalar_select %p881_p8, 1, 0 }
  0x34   : > { %p614_p12 = pnand %p612_p6, %p583_p5  ;;  %p620_p10 = scmp.lt.u32.totalorder %s611_s6, %s989_s1 }
  0x36   : > { %p615_p0 = pneg %p614_p12  ;;  %p621_p11 = por %p620_p10, %p618_p9 }
  0x38   : > { %p622_p1 = pnand %p621_p11, %p615_p0 }
  0x3a   : > { %625 = shalt.err (!%p622_p1)
}
  0x3b   : > { %s626_s17 = scalar_lea.vmem %s180_s3, 256  ;;  %s633_s22 = scalar_lea.vmem %s180_s3, 512 }
  0x3c   : > { %p627_p3 = scmp.ne.s32.totalorder %s180_s3, %s626_s17  ;;  %p634_p4 = scmp.lt.s32.totalorder %s180_s3, %s180_s3 }
  0x3d   : > { %p635_p8 = scmp.lt.s32.totalorder %s633_s22, %s626_s17 }
  0x3e   : > { %p629_p7 = pnand %p627_p3, %p583_p5 }
  0x3f   : > { %p636_p6 = por %p635_p8, %p634_p4 }
  0x40   : > { %p630_p13 = pneg %p629_p7 }
  0x42   : > { %p637_p12 = pnand %p636_p6, %p630_p13 }
  0x44   : > { %640 = shalt.err (!%p637_p12)
}
  0x45   : > { %488 = dma.hbm_to_vmem [thread:$0]  (!%p850_p2), %s989_s1, 256, %s180_s3, [#allocation7], %s751_s18, %s751_s18, %s752_s20  }
  0x46   : > { %p999_p0 = scmp.ne.s32.totalorder %s998_s27, 0 }
  0x47   : > { %s193_s4 = sand.u32 (!%p999_p0), 1, %s736_s13   ;;  %p1000_p5 = scmp.ne.s32.totalorder (!%p999_p0), %s994_s21, 0 }
  0x48   : > { %191 = sbr.rel (%p999_p0) target bundleno = 503 (0x1f7), region = 28  ;;  %s465_s5 = sshll.u32 (!%p999_p0), %s193_s4, 4 }
  0x49   : > { %s194_s6 = scalar_lea.sflag (!%p999_p0), [#allocation4], %s193_s4  ;;  %s197_s7 = scalar_lea.vmem (!%p999_p0), [#allocation3], %s465_s5 }
  0x4f   : > { %706 = dma.done.wait (%p1000_p5), %s194_s6, 256  }
  0x50   : > { %708 = vsyncadd (%p1000_p5), %s194_s6, 4294967040  ;;  %s203_s29 = scalar_lea.sflag [#allocation7], %s193_s4  ;;  %s206_s8 = scalar_lea.vmem [#allocation6], %s465_s5 }
  0x51   : > { %710 = dma.done.wait (%p1000_p5), %s203_s29, 256  }
  0x52   : > { %712 = vsyncadd (%p1000_p5), %s203_s29, 4294967040  ;;  %s229_s18 = sand.u32 1, %s724_s10   ;;  %vm245_vm0 = vcmask 253952   ;;  %v754_v0 = vmov 0.0   ;;  %p468_p2 = scmp.ge.s32.totalorder %s740_s14, 1 }
  0x53   : > { %s922_s20 = sshll.u32 %s229_s18, 3  ;;  %246 = vst.msk [vmem:[#allocation2] sm:$0x1] %vm245_vm0, %v754_v0  ;;  %v252_v1 = vld [vmem:[%s197_s7] sm:$0xff] (!%p468_p2)  ;;  %v253_v2 = vld [vmem:[%s197_s7 + $0x8] sm:$0xff] (!%p468_p2)  ;;  %s755_s21 = smov (!%p468_p2), 96   ;;  %v310_v39 = vlaneseq (!%p468_p2) }
  0x54   : > { %s231_s27 = scalar_lea.vmem [#allocation8], %s922_s20  ;;  %250 = sbr.rel (%p468_p2) target bundleno = 478 (0x1de), region = 44  ;;  %v256_v3 = vmax.f32 (!%p468_p2), %v252_v1, 1e-06  ;;  %v257_v4 = vmax.f32 (!%p468_p2), %v253_v2, 1e-06 }
  0x55   : > { %v254_v13 = vld [vmem:[%s206_s8] sm:$0xff] (!%p468_p2)  ;;  %v255_v15 = vld [vmem:[%s206_s8 + $0x8] sm:$0xff] (!%p468_p2)  ;;  %s756_s3 = smov (!%p468_p2), 32   ;;  %vm296_vm1 = vcmask (!%p468_p2), 523520   ;;  %v757_v37 = vmov (!%p468_p2), 1966171168  }
  0x56   : > { %573 = vrcp.f32 (!%p468_p2), %v256_v3  ;;  %v272_v14 = vsub.f32 (!%p468_p2), %v254_v13, %v252_v1  ;;  %v273_v17 = vsub.f32 (!%p468_p2), %v255_v15, %v253_v2  ;;  %v308_v38 = vunpack.c.l.s4 (!%p468_p2), %v757_v37 }
  0x57   : > { %575 = vrcp.f32 (!%p468_p2), %v257_v4  ;;  %v311_v43 = vshrl.u32 (!%p468_p2), %v310_v39, 7 }
  0x58   : > { %v274_v16 = vand.u32 (!%p468_p2), 2147483647, %v272_v14  ;;  %v275_v20 = vand.u32 (!%p468_p2), 2147483647, %v273_v17  ;;  %577 = vlog2.f32 (!%p468_p2), %v256_v3  ;;  %v309_v42 = vunpack.c.0.s8 (!%p468_p2), %v308_v38 }
  0x59   : > { %579 = vlog2.f32 (!%p468_p2), %v257_v4 }
  0x5a   : > { %v312_v46 = vsub.s32 (!%p468_p2), %v309_v42, %v311_v43  ;;  %v251_v50 = vld [vmem:[#allocation2] sm:$0x1] (!%p468_p2) }
  0x60   : > { %v574_v5 = vpop.eup %573 }
  0x61   : > { %v576_v6 = vpop.eup %575  ;;  %v260_v7 = vmul.f32 %v574_v5, %v256_v3 }
  0x62   : > { %v261_v8 = vmul.f32 %v576_v6, %v257_v4  ;;  %v578_v23 = vpop.eup %577 }
  0x63   : > { %v262_v9 = vsub.f32 2.0, %v260_v7  ;;  %v580_v24 = vpop.eup %579  ;;  %v267_v25 = vmul.f32 0.6931472, %v578_v23 }
  0x64   : > { %v263_v10 = vsub.f32 2.0, %v261_v8  ;;  %v269_v26 = vmul.f32 0.6931472, %v580_v24 }
  0x65   : > { %v264_v11 = vmul.f32 %v574_v5, %v262_v9  ;;  %v270_v27 = vadd.f32 0.6931472, %v267_v25 }
  0x66   : > { %v265_v12 = vmul.f32 %v576_v6, %v263_v10  ;;  %v271_v29 = vadd.f32 0.6931472, %v269_v26 }
  0x67   : > { %278 = vrot.lane.b32.xlu0 %v264_v11, %s755_s21 }
  0x6b   : > { %280 = vrot.lane.b32.xlu0 %v265_v12, %s755_s21 }
  0xd9   : > { %v279_v18 = vpop.permute.xlu0 %278 }
  0xda   : > { %v284_v19 = vmul.f32 %v279_v18, %v274_v16 }
  0xdc   : > { %288 = vrot.lane.b32.xlu1 %v284_v19, %s756_s3 }
  0xdd   : > { %v281_v21 = vpop.permute.xlu0 %280 }
  0xde   : > { %v285_v22 = vmul.f32 %v281_v21, %v275_v20 }
  0xe0   : > { %290 = vrot.lane.b32.xlu1 %v285_v22, %s756_s3 }
 0x14e   : > { %v289_v28 = vpop.permute.xlu1 %288 }
 0x14f   : > { %v294_v30 = vadd.f32 %v289_v28, %v270_v27 }
 0x151   : > { %v297_v33 = vsel %vm296_vm1, %v294_v30, 0.0 }
 0x152   : > { %v291_v31 = vpop.permute.xlu1 %290 }
 0x153   : > { %v295_v32 = vadd.f32 %v291_v31, %v271_v29 }
 0x155   : > { %v298_v34 = vsel %vm296_vm1, %v295_v32, 0.0 }
 0x156   : > { %v299_v35 = vadd.f32 %v298_v34, %v297_v33 }
 0x158   : > { %v300_v36 = vrot.slane %v299_v35, 4 }
 0x15a   : > { %v301_v40 = vadd.f32 %v300_v36, %v299_v35 }
 0x15c   : > { %v302_v41 = vrot.slane %v301_v40, 2 }
 0x15e   : > { %v303_v44 = vadd.f32 %v302_v41, %v301_v40 }
 0x160   : > { %v304_v45 = vrot.slane %v303_v44, 1 }
 0x162   : > { %v305_v47 = vadd.f32 %v304_v45, %v303_v44 }
 0x164   : > { %v313_v48 = vrot.slane %v305_v47, %v312_v46 }
 0x166   : > { %v320_v49 = vrot.slane %v313_v48, %v312_v46 }
 0x168   : > { %321 = vrot.lane.b32.xlu0 %v320_v49, %s755_s21 }
 0x1da   : > { %v322_v51 = vpop.permute.xlu0 %321 }
 0x1db   : > { %v324_v52 = vadd.f32 %v322_v51, %v251_v50 }
 0x1dd   : > { %326 = vst.msk [vmem:[#allocation2] sm:$0x1] %vm245_vm0, %v324_v52 }
 0x1de PF: > { %vm337_vm2 = vcmask 261120   ;;  %s471_s28 = sshll.u32 %s740_s14, 7  ;;  %s353_s23 = sshll.u32 %s231_s27, 4  ;;  %s354_s23 = int_to_ptr.vmem [resolvable:$true] %s353_s23 }
 0x1df   : > { %s937_s22 = scalar_lea.hbm %s990_s2, %s471_s28  ;;  %s340_s30 = scalar_lea.sflag [#allocation5], %s229_s18 }
 0x1e0   : > { %s641_s4 = scalar_lea.vmem %s354_s23, 128  ;;  %p1001_p9 = scmp.ne.s32.totalorder %s995_s25, 0 }
 0x1e1   : > { %p642_p8 = scmp.ne.s32.totalorder %s354_s23, %s641_s4  ;;  %s758_s5 = smov [#allocation8]  }
 0x1e2   : > { %s645_s6 = sshll.u32 %s758_s5, 4  ;;  %s646_s6 = int_to_ptr.vmem [resolvable:$false] %s645_s6 }
 0x1e3   : > { %p643_p10 = pnand %p642_p8, %p1001_p9  ;;  %s647_s14 = scalar_lea.vmem %s646_s6, 256 }
 0x1e4   : > { %v469_v53 = vld [vmem:[#allocation2] ss:$0 sm:$0xff]  ;;  %p648_p1 = scmp.lt.s32.totalorder %s354_s23, %s646_s6  ;;  %p649_p3 = scmp.lt.s32.totalorder %s647_s14, %s641_s4 }
 0x1e5   : > { %338 = vst.msk [vmem:[%s231_s27] sm:$0xff] %vm337_vm2, %v469_v53  ;;  %p644_p11 = pneg %p643_p10 }
 0x1e6   : > { %p650_p7 = por %p649_p3, %p648_p1 }
 0x1e8   : > { %p651_p13 = pnand %p650_p7, %p644_p11 }
 0x1ea   : > { %654 = shalt.err (!%p651_p13)
}
 0x1eb   : > { %s655_s7 = scalar_lea.hbm %s937_s22, 128  ;;  %s659_s18 = scalar_lea.hbm %s990_s2, 256 }
 0x1ec   : > { %p656_p4 = scmp.ne.s32.totalorder %s937_s22, %s655_s7  ;;  %p660_p0 = scmp.lt.u32.totalorder %s937_s22, %s990_s2 }
 0x1ed   : > { %p661_p5 = scmp.lt.u32.totalorder %s659_s18, %s655_s7  ;;  %p663_p8 = scmp.lt.u32.totalorder %s655_s7, %s937_s22 }
 0x1ee   : > { %p657_p6 = pnand %p656_p4, %p1001_p9 }
 0x1ef   : > { %p662_p2 = por %p661_p5, %p660_p0 }
 0x1f0   : > { %p658_p12 = pneg %p657_p6 }
 0x1f1   : > { %p664_p10 = por %p663_p8, %p662_p2 }
 0x1f3   : > { %p665_p11 = pnand %p664_p10, %p658_p12 }
 0x1f5   : > { %668 = shalt.err (!%p665_p11)
}
 0x1f6   : > { %480 = dma.vmem_to_hbm [thread:$0]  (%p1001_p9), %s354_s23, 128, %s937_s22, %s340_s30  }
 0x1f7 PF: > { %s365_s21 = sand.u32 1, %s720_s9   ;;  %p1002_p1 = scmp.ne.s32.totalorder %s996_s26, 0 }
 0x1f8   : > { %p1003_p3 = scmp.ge.s32.totalorder %s748_s16, 2  ;;  %s366_s3 = scalar_lea.sflag [#allocation5], %s365_s21 }
 0x1fa   : > { %p490_p7 = pnand %p1003_p3, %p1002_p1 }
 0x1fc   : > { %714 = dma.done.wait (!%p490_p7), %s366_s3, 128  }
 0x1fd   : > { %716 = vsyncadd (!%p490_p7), %s366_s3, 4294967168  ;;  %s21_s16 = sadd.s32 1, %s748_s16   ;;  %s1004_s9 = smov %s724_s10 }
 0x1fe   : > { %p18_p13 = scmp.ge.s32.totalorder %s21_s16, 4   ;;  %s1005_s10 = smov %s728_s11 }
 0x1ff   : > { %s1006_s11 = smov %s832_s24  ;;  %s1007_s12 = smov %s736_s13 }
 0x200   : > { %s978_s13 = smov 0   ;;  %s1008_s14 = smov %s744_s15 }
 0x201   : > { %s1009_s15 = smov %s1011_s19  ;;  %20 = sbr.rel (!%p18_p13) target bundleno = 9 (0x9), region = 98 }
 0x208   :  { %371 = vsyncpa [#allocation4], 1 }
 0x209   :  { %373 = vsyncpa [#allocation4 + $0x1], 1 }
 0x20a   :  { %374 = vsyncpa [#allocation7], 1 }
 0x20b   :  { %376 = vsyncpa [#allocation7 + $0x1], 1 }
 0x20c   :  { %377 = vsyncpa [#allocation5], 1 }
 0x20d   :  { %379 = vsyncpa [#allocation5 + $0x1], 1 }

</bundles_post_ra>
